<compile_context>
chip_gen: v7x
topology: tpu7x:2x2x1
jax: 0.10.0
libtpu: 0.0.40
codegen_flags: <defaults>
</compile_context>

<pallas_src>
import jax
import jax.numpy as jnp
from jax.experimental import pallas as pl
from jax.experimental.pallas import tpu as pltpu

_COS_EPS = 1e-8   # F.cosine_similarity default eps
_BN_EPS = 1e-5    # nn.BatchNorm1d default eps
_LANE = 128


def accent_cls_kernel(x_ref, w_ref, b_ref, t_ref, out_ref):
    # x tile: (TB, D_in)
    x = x_ref[...]
    # Folded bn1 + Linear + bn2:  h = x @ W_eff + b_eff        -> (TB, H)
    h = jnp.dot(x, w_ref[...], preferred_element_type=jnp.float32)
    h = h + b_ref[...]
    # Numerator vs pre-normalized template columns              -> (TB, C_pad)
    num = jnp.dot(h, t_ref[...], preferred_element_type=jnp.float32)
    # Row norms of h; reciprocal goes to the EUP slot.
    h_norm = jnp.sqrt(jnp.sum(h * h, axis=1, keepdims=True))    # (TB, 1)
    inv = pl.reciprocal(jnp.maximum(h_norm, jnp.float32(_COS_EPS)))
    out_ref[...] = num * inv


def fold_params(params):
    """One-time host-side folding of BN1/BN2/bias into W_eff/b_eff and
    pre-normalization + lane-padding of the template."""
    scale1 = params["bn1_gamma"] / jnp.sqrt(params["bn1_var"] + _BN_EPS)
    shift1 = params["bn1_beta"] - params["bn1_mean"] * scale1
    scale2 = params["bn2_gamma"] / jnp.sqrt(params["bn2_var"] + _BN_EPS)
    shift2 = params["bn2_beta"] - params["bn2_mean"] * scale2

    w_t = params["w_t"]                                   # (D_in, H)
    w_eff = scale1[:, None] * w_t * scale2[None, :]        # (D_in, H)
    b_eff = (shift1 @ w_t + params["b"]) * scale2 + shift2  # (H,)

    t = params["template"]                                 # (H, C)
    num_class = t.shape[1]
    t_norm = jnp.sqrt(jnp.sum(t * t, axis=0, keepdims=True))
    t_hat = t / jnp.maximum(t_norm, _COS_EPS)
    # Pad the class dimension to a lane-dense multiple of 128.
    c_pad = max(_LANE, ((num_class + _LANE - 1) // _LANE) * _LANE)
    t_hat = jnp.pad(t_hat, ((0, 0), (0, c_pad - num_class)))

    return {
        "w_eff": w_eff,
        "b_eff": b_eff.reshape(1, -1),
        "t_hat": t_hat,
        "num_class": num_class,
    }


def accent_cls_forward(x, folded):
    """x: (B, input_dim) float32.  Returns cosine_sim: (B, num_class)."""
    B, d_in = x.shape
    w_eff = folded["w_eff"]
    hidden = w_eff.shape[1]
    t_hat = folded["t_hat"]
    c_pad = t_hat.shape[1]
    b_eff = folded["b_eff"]
    num_class = folded["num_class"]

    # Batch tile: keep whole batch if small, otherwise 256-row MXU-sized tiles.
    tb = B if B <= 256 else 256
    grid = (pl.cdiv(B, tb),)

    out = pl.pallas_call(
        accent_cls_kernel,
        out_shape=jax.ShapeDtypeStruct((B, c_pad), jnp.float32),
        grid=grid,
        in_specs=[
            pl.BlockSpec((tb, d_in), lambda i: (i, 0)),        # x (tiled over B)
            pl.BlockSpec((d_in, hidden), lambda i: (0, 0)),    # W_eff (grid-invariant)
            pl.BlockSpec((1, hidden), lambda i: (0, 0)),       # b_eff (grid-invariant)
            pl.BlockSpec((hidden, c_pad), lambda i: (0, 0)),   # t_hat (grid-invariant)
        ],
        out_specs=pl.BlockSpec((tb, c_pad), lambda i: (i, 0)),
        compiler_params=pltpu.CompilerParams(
            dimension_semantics=("parallel",)),
    )(x, w_eff, b_eff, t_hat)

    # Drop the zero-padded lane columns.
    return out[:, :num_class]


def make_params(key, input_dim, hidden_dim, num_class):
    ks = jax.random.split(key, 10)
    params = {
        # nn.Parameter(torch.randn(1, hidden_dim, num_class)) -> stored (H, C)
        "template": jax.random.normal(ks[0], (hidden_dim, num_class),
                                      jnp.float32),
        # nn.Linear(input_dim, hidden_dim): weight (H, D_in) -> store transposed
        "w_t": jax.random.normal(ks[1], (input_dim, hidden_dim),
                                 jnp.float32) * 0.1,
        "b": jax.random.normal(ks[2], (hidden_dim,), jnp.float32) * 0.1,
        # bn1 over input_dim
        "bn1_gamma": 1.0 + 0.1 * jax.random.normal(ks[3], (input_dim,),
                                                   jnp.float32),
        "bn1_beta": 0.1 * jax.random.normal(ks[4], (input_dim,), jnp.float32),
        "bn1_mean": 0.1 * jax.random.normal(ks[5], (input_dim,), jnp.float32),
        "bn1_var": jnp.abs(jax.random.normal(ks[6], (input_dim,),
                                             jnp.float32)) + 0.5,
        # bn2 over hidden_dim
        "bn2_gamma": 1.0 + 0.1 * jax.random.normal(ks[7], (hidden_dim,),
                                                   jnp.float32),
        "bn2_beta": 0.1 * jax.random.normal(ks[8], (hidden_dim,), jnp.float32),
        "bn2_mean": jnp.zeros((hidden_dim,), jnp.float32),
        "bn2_var": jnp.ones((hidden_dim,), jnp.float32),
    }
    return params


def reference_forward(x, params):
    """Pure-JAX reference of the original (unfolded) module semantics."""
    scale1 = params["bn1_gamma"] / jnp.sqrt(params["bn1_var"] + _BN_EPS)
    shift1 = params["bn1_beta"] - params["bn1_mean"] * scale1
    scale2 = params["bn2_gamma"] / jnp.sqrt(params["bn2_var"] + _BN_EPS)
    shift2 = params["bn2_beta"] - params["bn2_mean"] * scale2
    y = x * scale1 + shift1
    h = y @ params["w_t"] + params["b"]
    h = h * scale2 + shift2
    t = params["template"]
    num = h @ t
    denom = (jnp.maximum(jnp.linalg.norm(h, axis=1, keepdims=True), _COS_EPS) *
             jnp.maximum(jnp.linalg.norm(t, axis=0, keepdims=True), _COS_EPS))
    return num / denom


if __name__ == "__main__":
    B, input_dim, hidden_dim, num_class = 8, 64, 32, 4

    key = jax.random.PRNGKey(0)
    k_x, k_p = jax.random.split(key)
    x = jax.random.normal(k_x, (B, input_dim), jnp.float32)
    params = make_params(k_p, input_dim, hidden_dim, num_class)

    # One-time parameter folding (done at load time, not per call).
    folded = fold_params(params)

    cos_sim = accent_cls_forward(x, folded)
    cos_sim = jax.block_until_ready(cos_sim)

    ref = reference_forward(x, params)
    assert cos_sim.shape == (B, num_class)
    # Folding changes f32 associativity slightly; tolerance covers that.
    assert jnp.allclose(cos_sim, ref, atol=1e-4, rtol=1e-4), (
        "mismatch vs pure-JAX reference")

    print("KERNEL_OK")
</pallas_src>

<mosaic_0001>
module attributes {stable_mosaic.version = 11 : i64} {
  func.func @accent_cls_kernel(%arg0: i32, %arg1: memref<8x64xf32, #tpu.memory_space<vmem>>, %arg2: memref<64x32xf32, #tpu.memory_space<vmem>>, %arg3: memref<1x32xf32, #tpu.memory_space<vmem>>, %arg4: memref<32x128xf32, #tpu.memory_space<vmem>>, %arg5: memref<8x128xf32, #tpu.memory_space<vmem>>) attributes {dimension_semantics = [#tpu.dimension_semantics<parallel>], iteration_bounds = array<i64: 1>, scalar_prefetch = 0 : i64, scratch_operands = 0 : i64, tpu.core_type = #tpu.core_type<tc>, window_params = [{transform_indices = @transform_0, window_bounds = array<i64: 8, 64>}, {pipeline_mode = #tpu.pipeline_mode<synchronous>, transform_indices = @transform_1, window_bounds = array<i64: 64, 32>}, {pipeline_mode = #tpu.pipeline_mode<synchronous>, transform_indices = @transform_2, window_bounds = array<i64: 1, 32>}, {pipeline_mode = #tpu.pipeline_mode<synchronous>, transform_indices = @transform_3, window_bounds = array<i64: 32, 128>}, {transform_indices = @transform_4, window_bounds = array<i64: 8, 128>}]} {
    %c0 = arith.constant 0 : index
    %c0_0 = arith.constant 0 : index
    %0 = vector.load %arg1[%c0, %c0_0] : memref<8x64xf32, #tpu.memory_space<vmem>>, vector<8x64xf32>
    %c0_1 = arith.constant 0 : index
    %c0_2 = arith.constant 0 : index
    %1 = vector.load %arg2[%c0_1, %c0_2] : memref<64x32xf32, #tpu.memory_space<vmem>>, vector<64x32xf32>
    %cst = arith.constant dense<0.000000e+00> : vector<8x32xf32>
    %2 = tpu.matmul %0, %1, %cst {dimension_numbers = #tpu.dot_dimension_numbers<[1], [0], [0], [1], [0, 0, 1, 1], [], []>} : vector<8x64xf32>, vector<64x32xf32>, vector<8x32xf32> -> vector<8x32xf32>
    %c0_3 = arith.constant 0 : index
    %c0_4 = arith.constant 0 : index
    %3 = vector.load %arg3[%c0_3, %c0_4] : memref<1x32xf32, #tpu.memory_space<vmem>>, vector<1x32xf32>
    %4 = vector.broadcast %3 : vector<1x32xf32> to vector<8x32xf32>
    %5 = arith.addf %2, %4 : vector<8x32xf32>
    %c0_5 = arith.constant 0 : index
    %c0_6 = arith.constant 0 : index
    %6 = vector.load %arg4[%c0_5, %c0_6] : memref<32x128xf32, #tpu.memory_space<vmem>>, vector<32x128xf32>
    %cst_7 = arith.constant dense<0.000000e+00> : vector<8x128xf32>
    %7 = tpu.matmul %5, %6, %cst_7 {dimension_numbers = #tpu.dot_dimension_numbers<[1], [0], [0], [1], [0, 0, 1, 1], [], []>} : vector<8x32xf32>, vector<32x128xf32>, vector<8x128xf32> -> vector<8x128xf32>
    %8 = arith.mulf %5, %5 : vector<8x32xf32>
    %cst_8 = arith.constant dense<0.000000e+00> : vector<8xf32>
    %9 = vector.multi_reduction <add>, %8, %cst_8 [1] : vector<8x32xf32> to vector<8xf32>
    %10 = vector.shape_cast %9 : vector<8xf32> to vector<8x1xf32>
    %11 = math.sqrt %10 : vector<8x1xf32>
    %cst_9 = arith.constant 9.99999993E-9 : f32
    %12 = vector.broadcast %cst_9 : f32 to vector<8x1xf32>
    %13 = arith.maximumf %11, %12 : vector<8x1xf32>
    %14 = tpu.reciprocal %13 : vector<8x1xf32> -> vector<8x1xf32>
    %15 = vector.broadcast %14 : vector<8x1xf32> to vector<8x128xf32>
    %16 = arith.mulf %7, %15 : vector<8x128xf32>
    %c0_10 = arith.constant 0 : index
    %c0_11 = arith.constant 0 : index
    %17 = vector.load %arg5[%c0_10, %c0_11] : memref<8x128xf32, #tpu.memory_space<vmem>>, vector<8x128xf32>
    tpu.vector_store %arg5[%c0_10, %c0_11], %16 {strides = array<i32>} : memref<8x128xf32, #tpu.memory_space<vmem>>, vector<8x128xf32>,
    return
  }
  func.func @transform_0(%arg0: i32) -> (i32, i32) {
    %c0_i32 = arith.constant 0 : i32
    %c0_i32_0 = arith.constant 0 : i32
    return %arg0, %c0_i32 : i32, i32
  }
  func.func @transform_1(%arg0: i32) -> (i32, i32) {
    %c0_i32 = arith.constant 0 : i32
    %c0_i32_0 = arith.constant 0 : i32
    %c0_i32_1 = arith.constant 0 : i32
    return %c0_i32, %c0_i32_0 : i32, i32
  }
  func.func @transform_2(%arg0: i32) -> (i32, i32) {
    %c0_i32 = arith.constant 0 : i32
    %c0_i32_0 = arith.constant 0 : i32
    %c0_i32_1 = arith.constant 0 : i32
    return %c0_i32, %c0_i32_0 : i32, i32
  }
  func.func @transform_3(%arg0: i32) -> (i32, i32) {
    %c0_i32 = arith.constant 0 : i32
    %c0_i32_0 = arith.constant 0 : i32
    %c0_i32_1 = arith.constant 0 : i32
    return %c0_i32, %c0_i32_0 : i32, i32
  }
  func.func @transform_4(%arg0: i32) -> (i32, i32) {
    %c0_i32 = arith.constant 0 : i32
    %c0_i32_0 = arith.constant 0 : i32
    return %arg0, %c0_i32 : i32, i32
  }
}

</mosaic_0001>

<bundles_post_ra>
// kernel: tpu_custom_call.1
= control target key start
LH: loop header
LB: loop body
LE: loop exit
PB: predicated region body
PF: predicated region fallthrough
CT: control target
= control target key end

     0   :  { %v312_v3 = vmov 0.0|0.0   ;;  %vm313_vm0 = vmmov 0   ;;  %v314_v6 = vmov 0.0   ;;  %s395_s0 = inlined_call_operand.vmem [shape: f32[8,64], index: 0, kind: input, shape index: {}]   ;;  %s396_s1 = inlined_call_operand.vmem [shape: f32[64,32], index: 1, kind: input, shape index: {}]   ;;  %s397_s2 = inlined_call_operand.vmem [shape: f32[1,32], index: 2, kind: input, shape index: {}]   ;;  %s398_s3 = inlined_call_operand.vmem [shape: f32[32,128], index: 3, kind: input, shape index: {}]   ;;  %s399_s4 = inlined_call_operand.hbm [shape: f32[8,128], index: 4, kind: output, shape index: {}]  }
   0x1   :  { %v19_v0 = vld [vmem:[%s396_s1] sm:$0xff]  ;;  %v20_v1 = vld [vmem:[%s396_s1 + $0x8] sm:$0xff]  ;;  %v21_v2 = vld [vmem:[%s396_s1 + $0x10] sm:$0xff]  ;;  %262 = vmatprep.subr.bf16.mxu0 %v312_v3  ;;  %248 = vmatprep.mubr.msk.f32.mxu0 %vm313_vm0, %v314_v6 }
   0x2   :  { %v263_v4 = vpack.c.bf16 %v20_v1, %v19_v0  ;;  %v22_v5 = vld [vmem:[%s396_s1 + $0x18] sm:$0xff]  ;;  %274 = vmatprep.subr.bf16.mxu1 %v312_v3  ;;  %259 = vmatprep.mubr.msk.f32.mxu1 %vm313_vm0, %v314_v6  ;;  %v108_v8 = vld [vmem:[%s398_s3] sm:$0xff]  ;;  %v109_v9 = vld [vmem:[%s398_s3 + $0x8] sm:$0xff] }
   0x3   :  { %v266_v7 = vpack.c.bf16 %v22_v5, %v21_v2  ;;  %v23_v10 = vld [vmem:[%s396_s1 + $0x20] sm:$0xff]  ;;  %v24_v11 = vld [vmem:[%s396_s1 + $0x28] sm:$0xff]  ;;  %v275_v12 = vpack.c.bf16 %v109_v9, %v108_v8 }
   0x4   :  { %264 = vmatpush3.bf16.msra.mxu0 %v263_v4 }
   0x5   :  { %265 = vmatprep.subr.bf16.mxu0 %v312_v3 }
   0x6   :  { %9 = vsyncpa [#allocation3], 0  ;;  %276 = vmatpush3.bf16.msra.mxu1 %v275_v12  ;;  %v269_v13 = vpack.c.bf16 %v24_v11, %v23_v10  ;;  %v25_v14 = vld [vmem:[%s396_s1 + $0x30] sm:$0xff]  ;;  %v26_v15 = vld [vmem:[%s396_s1 + $0x38] sm:$0xff]  ;;  %vm34_vm1 = vcmask 523264   ;;  %vm112_vm2 = vcmask 261120  }
   0x7   :  { %277 = vmatprep.subr.bf16.mxu1 %v312_v3  ;;  %v272_v16 = vpack.c.bf16 %v26_v15, %v25_v14  ;;  %v18_v17 = vld [vmem:[%s395_s0] sm:$0xff]  ;;  %v110_v18 = vld [vmem:[%s398_s3 + $0x10] sm:$0xff]  ;;  %v111_v19 = vld [vmem:[%s398_s3 + $0x18] sm:$0xff]  ;;  %s315_s0 = smov [#allocation2]  }
   0x8   :  { %267 = vmatpush3.bf16.msra.mxu0 %v266_v7  ;;  %v278_v20 = vpack.c.bf16 %v111_v19, %v110_v18  ;;  %v215_v21 = vld [vmem:[%s397_s2] ss:$0 sm:$0xff]  ;;  %s207_s2 = sshll.u32 %s315_s0, 4  ;;  %s208_s2 = int_to_ptr.vmem [resolvable:$true] %s207_s2 }
   0x9   :  { %268 = vmatprep.subr.bf16.mxu0 %v312_v3  ;;  %s288_s3 = scalar_lea.vmem %s208_s2, 128  ;;  %p293_p1 = scmp.lt.s32.totalorder %s208_s2, %s208_s2 }
   0xa   :  { %279 = vmatpush3.bf16.msra.mxu1 %v278_v20  ;;  %p289_p0 = scmp.ne.s32.totalorder %s208_s2, %s288_s3  ;;  %p294_p2 = scmp.lt.s32.totalorder %s288_s3, %s288_s3 }
   0xc   :  { %270 = vmatpush3.bf16.msra.mxu0 %v269_v13  ;;  %p295_p3 = por %p294_p2, %p293_p1 }
   0xd   :  { %271 = vmatprep.subr.bf16.mxu0 %v312_v3 }
   0xe   :  { %p296_p4 = pnand %p295_p3, %p289_p0 }
  0x10   :  { %273 = vmatpush3.bf16.msra.mxu0 %v272_v16 }
  0x13   :  { %249 = vmatmul.mubr.msk.f32.vlgmr.msra.gmra.mrb[0].mxu0 %vm34_vm1, %v18_v17 }
  0xe6   :  { %v104_v22 = vpop.f32.mrb[0].mxu0 }
  0xe7   :  { %v105_v23 = vadd.f32 %v215_v21, %v104_v22  ;;  %v250_v24 = vpop.f32.mrb[1].mxu0 }
  0xe9   :  { %260 = vmatmul.mubr.msk.f32.vlgmr.msra.gmra.mrb[0].mxu1 %vm112_vm2, %v105_v23  ;;  %v186_v25 = vmul.f32 %v105_v23, %v105_v23 }
  0xeb   :  { %v187_v26 = vsel %vm112_vm2, %v186_v25, 0.0 }
  0xec   :  { %188 = vadd.xlane.f32.xlu0 %v187_v26 }
 0x179   :  { %v189_v27 = vpop.xlane.xlu0 %188 }
 0x17a   :  { %284 = vrsqrt.f32 %v189_v27  ;;  %vm192_vm3 = vcmp.eq.f32.partialorder %v189_v27, inf  ;;  %v195_v31 = vand.u32 2147483648, %v189_v27  ;;  %vm194_vm4 = vcmp.eq.f32.partialorder %v189_v27, 0.0 }
 0x184   :  { %v285_v28 = vpop.eup %284 }
 0x185   :  { %v191_v29 = vmul.f32 %v285_v28, %v189_v27 }
 0x187   :  { %v193_v30 = vsel %vm192_vm3, %v189_v27, %v191_v29 }
 0x188   :  { %v196_v32 = vsel %vm194_vm4, %v195_v31, %v193_v30 }
 0x189   :  { %v197_v33 = vmax.f32 %v196_v32, 1e-08 }
 0x18b   :  { %286 = vrcp.f32 %v197_v33 }
 0x195   :  { %v287_v34 = vpop.eup %286 }
 0x1bc   :  { %v182_v35 = vpop.f32.mrb[0].mxu1 }
 0x1bd   :  { %v199_v36 = vmul.f32 %v287_v34, %v182_v35  ;;  %v261_v37 = vpop.f32.mrb[1].mxu1 }
 0x1bf   :  { %200 = vst [vmem:[#allocation2] sm:$0xff] %v199_v36 }
 0x1c0   :  { %299 = shalt.err (!%p296_p4)
}
 0x1c1   :  { %s300_s18 = scalar_lea.hbm %s399_s4, 128 }
 0x1c2   :  { %p301_p5 = scmp.ne.s32.totalorder %s399_s4, %s300_s18  ;;  %p304_p6 = scmp.lt.u32.totalorder %s300_s18, %s399_s4 }
 0x1c4   :  { %p306_p7 = pnand %p304_p6, %p301_p5 }
 0x1c6   :  { %309 = shalt.err (!%p306_p7)
}
 0x1c7   :  { %210 = dma.vmem_to_hbm [thread:$0]  %s208_s2, 128, %s399_s4, [#allocation3]  }
 0x1c8   :  { %310 = dma.done.wait [#allocation3], 128  }
 0x1c9   :  { %311 = vsyncadd [#allocation3], 4294967168 }
 0x1ca   :  { %214 = vsyncpa [#allocation3], 1 }

</bundles_post_ra>
